<compile_context>
chip_gen: v7x
topology: tpu7x:2x2x1
jax: 0.10.0
libtpu: 0.0.40
codegen_flags: <defaults>
</compile_context>

<pallas_src>
import jax
import jax.numpy as jnp
from jax import lax
from jax.experimental import pallas as pl
from jax.experimental.pallas import tpu as pltpu


def _classifier_kernel(x_ref, params_ref, y_ref, logits_ref, preds_ref, stats_ref):
    B, D = x_ref.shape
    C = logits_ref.shape[1]

    # ---- LayerNorm statistics over the feature dim (eps=1e-5, biased var).
    #      The affine (gamma/beta) is already folded into params. ----
    x = x_ref[...].astype(jnp.float32)                         # (B, D)
    mean = jnp.mean(x, axis=-1, keepdims=True)
    xc = x - mean
    var = jnp.mean(xc * xc, axis=-1, keepdims=True)
    xn = xc * lax.rsqrt(var + 1e-5)                            # (B, D)

    # ---- Linear on the VPU/XLU (C=4: MXU would be <1% utilized).
    #      Statically unrolled per-class mul + lane reduce; all 2-D. ----
    params = params_ref[...]                                   # (C+1, D)
    cols = []
    for c in range(C):                                         # static unroll
        w_c = params[c:c + 1, :]                               # (1, D)
        cols.append(jnp.sum(xn * w_c, axis=-1, keepdims=True)) # (B, 1)
    bias = params[C:C + 1, :C]                                 # (1, C) folded bias
    logits = jnp.concatenate(cols, axis=-1) + bias             # (B, C)
    logits_ref[...] = logits

    # ---- argmax (first maximal index, matches torch/jnp argmax) ----
    cls_idx = lax.broadcasted_iota(jnp.int32, logits.shape, 1)        # (B, C)
    max_logit = jnp.max(logits, axis=-1, keepdims=True)               # (B, 1)
    preds = jnp.min(jnp.where(logits == max_logit, cls_idx, C),
                    axis=-1, keepdims=True)                           # (B, 1) int32
    preds_ref[...] = preds

    # ---- cross-entropy (mean) + accuracy, reduced in-kernel to one (1,2) ----
    lse = max_logit + jnp.log(jnp.sum(jnp.exp(logits - max_logit),
                                      axis=-1, keepdims=True))        # (B, 1)
    y = y_ref[...]                                                    # (B, 1) int32
    onehot = (cls_idx == y).astype(jnp.float32)                       # (B, C)
    picked = jnp.sum(logits * onehot, axis=-1, keepdims=True)         # (B, 1)
    per_loss = lse - picked                                           # (B, 1)
    correct = (preds == y).astype(jnp.float32)                        # (B, 1)

    inv_b = jnp.float32(1.0 / B)
    stats = jnp.concatenate([per_loss, correct], axis=-1)             # (B, 2)
    stats_ref[...] = jnp.sum(stats, axis=0, keepdims=True) * inv_b    # (1, 2)


def pack_params(gamma, beta, weight, bias):
    """Fold the LayerNorm affine into the Linear and pack into one f32 slab.

    weight is PyTorch nn.Linear layout (C, D).  Returns (C+1, D):
      rows 0..C-1 : W'[c, d] = W[c, d] * gamma[d]
      row  C      : b'[c]    = sum_d beta[d] * W[c, d] + bias[c], padded to D.
    Done once at parameter-prep time (outside the hot path); exact up to
    fp rounding order.
    """
    C, D = weight.shape
    assert C <= D, "packed bias row requires num_classes <= input_size"
    w_folded = (weight * gamma[None, :]).astype(jnp.float32)          # (C, D)
    b_folded = (weight @ beta + bias).astype(jnp.float32)             # (C,)
    bias_row = jnp.zeros((1, D), jnp.float32).at[0, :C].set(b_folded) # (1, D)
    return jnp.concatenate([w_folded, bias_row], axis=0)              # (C+1, D)


def linear_classifier_forward(x, y, params):
    """Mirrors LinearClassifier.forward: returns (logits, predictions, loss, accuracy).

    `params` is the (C+1, D) slab produced by pack_params().
    """
    B, D = x.shape
    C = params.shape[0] - 1
    y2d = y.astype(jnp.int32).reshape(B, 1)

    vmem = pl.BlockSpec(memory_space=pltpu.MemorySpace.VMEM)
    logits, preds2d, stats = pl.pallas_call(
        _classifier_kernel,
        in_specs=[vmem, vmem, vmem],
        out_specs=[vmem, vmem, vmem],
        out_shape=[
            jax.ShapeDtypeStruct((B, C), jnp.float32),   # logits
            jax.ShapeDtypeStruct((B, 1), jnp.int32),     # predictions
            jax.ShapeDtypeStruct((1, 2), jnp.float32),   # [mean CE loss, accuracy]
        ],
    )(x, params, y2d)

    predictions = preds2d.reshape(B)
    loss = stats[0, 0]
    accuracy = stats[0, 1]
    return logits, predictions, loss, accuracy


if __name__ == "__main__":
    # config: embedding_dim=8, num_frames=2 -> input_size = 8*2*2 = 32; num_classes=4
    embedding_dim, num_frames, num_classes = 8, 2, 4
    input_size = int(embedding_dim * num_frames * 2)
    batch = 8

    key = jax.random.PRNGKey(0)
    kx, ky, kw, kb, kg, kbt = jax.random.split(key, 6)

    x = jax.random.normal(kx, (batch, input_size), dtype=jnp.float32)
    y = jax.random.randint(ky, (batch,), 0, num_classes, dtype=jnp.int32)

    # Non-trivial affine params so the gamma/beta fold is actually exercised.
    gamma = 1.0 + 0.1 * jax.random.normal(kg, (input_size,), jnp.float32)
    beta = 0.1 * jax.random.normal(kbt, (input_size,), jnp.float32)
    bound = 1.0 / (float(input_size) ** 0.5)
    weight = jax.random.uniform(kw, (num_classes, input_size), jnp.float32, -bound, bound)
    bias = jax.random.uniform(kb, (num_classes,), jnp.float32, -bound, bound)

    # Parameter prep: done once, outside the per-call hot path.
    params = jax.block_until_ready(pack_params(gamma, beta, weight, bias))

    fwd = jax.jit(linear_classifier_forward)
    logits, preds, loss, acc = fwd(x, y, params)
    jax.block_until_ready((logits, preds, loss, acc))

    # quick sanity check against pure-JAX reference (original, un-folded math)
    xn_ref = (x - x.mean(-1, keepdims=True)) / jnp.sqrt(x.var(-1, keepdims=True) + 1e-5)
    logits_ref = (xn_ref * gamma + beta) @ weight.T + bias
    preds_ref = jnp.argmax(logits_ref, axis=1).astype(jnp.int32)
    lp_ref = jax.nn.log_softmax(logits_ref, axis=-1)
    loss_ref = -jnp.mean(lp_ref[jnp.arange(batch), y])
    acc_ref = jnp.mean((preds_ref == y).astype(jnp.float32))

    assert jnp.allclose(logits, logits_ref, atol=1e-4), "logits mismatch"
    assert jnp.array_equal(preds, preds_ref), "predictions mismatch"
    assert jnp.allclose(loss, loss_ref, atol=1e-4), "loss mismatch"
    assert jnp.allclose(acc, acc_ref, atol=1e-6), "accuracy mismatch"

    print("KERNEL_OK")
</pallas_src>

<mosaic_0001>
module attributes {stable_mosaic.version = 11 : i64} {
  func.func @_classifier_kernel(%arg0: memref<8x32xf32, #tpu.memory_space<vmem>>, %arg1: memref<5x32xf32, #tpu.memory_space<vmem>>, %arg2: memref<8x1xi32, #tpu.memory_space<vmem>>, %arg3: memref<8x4xf32, #tpu.memory_space<vmem>>, %arg4: memref<8x1xi32, #tpu.memory_space<vmem>>, %arg5: memref<1x2xf32, #tpu.memory_space<vmem>>) attributes {dimension_semantics = [], scalar_prefetch = 0 : i64, scratch_operands = 0 : i64, tpu.core_type = #tpu.core_type<tc>} {
    %c0 = arith.constant 0 : index
    %c0_0 = arith.constant 0 : index
    %0 = vector.load %arg0[%c0, %c0_0] : memref<8x32xf32, #tpu.memory_space<vmem>>, vector<8x32xf32>
    %cst = arith.constant dense<0.000000e+00> : vector<8xf32>
    %1 = vector.multi_reduction <add>, %0, %cst [1] : vector<8x32xf32> to vector<8xf32>
    %2 = vector.shape_cast %1 : vector<8xf32> to vector<8x1xf32>
    %cst_1 = arith.constant 3.200000e+01 : f32
    %3 = vector.broadcast %cst_1 : f32 to vector<8x1xf32>
    %4 = arith.divf %2, %3 : vector<8x1xf32>
    %5 = vector.broadcast %4 : vector<8x1xf32> to vector<8x32xf32>
    %6 = arith.subf %0, %5 : vector<8x32xf32>
    %7 = arith.mulf %6, %6 : vector<8x32xf32>
    %cst_2 = arith.constant dense<0.000000e+00> : vector<8xf32>
    %8 = vector.multi_reduction <add>, %7, %cst_2 [1] : vector<8x32xf32> to vector<8xf32>
    %9 = vector.shape_cast %8 : vector<8xf32> to vector<8x1xf32>
    %cst_3 = arith.constant 3.200000e+01 : f32
    %10 = vector.broadcast %cst_3 : f32 to vector<8x1xf32>
    %11 = arith.divf %9, %10 : vector<8x1xf32>
    %cst_4 = arith.constant 9.99999974E-6 : f32
    %12 = vector.broadcast %cst_4 : f32 to vector<8x1xf32>
    %13 = arith.addf %11, %12 : vector<8x1xf32>
    %14 = math.rsqrt %13 : vector<8x1xf32>
    %15 = vector.broadcast %14 : vector<8x1xf32> to vector<8x32xf32>
    %16 = arith.mulf %6, %15 : vector<8x32xf32>
    %c0_5 = arith.constant 0 : index
    %c0_6 = arith.constant 0 : index
    %17 = vector.load %arg1[%c0_5, %c0_6] : memref<5x32xf32, #tpu.memory_space<vmem>>, vector<5x32xf32>
    %18 = vector.extract_strided_slice %17 {offsets = [0, 0], sizes = [1, 32], strides = [1, 1]} : vector<5x32xf32> to vector<1x32xf32>
    %19 = vector.broadcast %18 : vector<1x32xf32> to vector<8x32xf32>
    %20 = arith.mulf %16, %19 : vector<8x32xf32>
    %cst_7 = arith.constant dense<0.000000e+00> : vector<8xf32>
    %21 = vector.multi_reduction <add>, %20, %cst_7 [1] : vector<8x32xf32> to vector<8xf32>
    %22 = vector.shape_cast %21 : vector<8xf32> to vector<8x1xf32>
    %23 = vector.extract_strided_slice %17 {offsets = [1, 0], sizes = [1, 32], strides = [1, 1]} : vector<5x32xf32> to vector<1x32xf32>
    %24 = vector.broadcast %23 : vector<1x32xf32> to vector<8x32xf32>
    %25 = arith.mulf %16, %24 : vector<8x32xf32>
    %cst_8 = arith.constant dense<0.000000e+00> : vector<8xf32>
    %26 = vector.multi_reduction <add>, %25, %cst_8 [1] : vector<8x32xf32> to vector<8xf32>
    %27 = vector.shape_cast %26 : vector<8xf32> to vector<8x1xf32>
    %28 = vector.extract_strided_slice %17 {offsets = [2, 0], sizes = [1, 32], strides = [1, 1]} : vector<5x32xf32> to vector<1x32xf32>
    %29 = vector.broadcast %28 : vector<1x32xf32> to vector<8x32xf32>
    %30 = arith.mulf %16, %29 : vector<8x32xf32>
    %cst_9 = arith.constant dense<0.000000e+00> : vector<8xf32>
    %31 = vector.multi_reduction <add>, %30, %cst_9 [1] : vector<8x32xf32> to vector<8xf32>
    %32 = vector.shape_cast %31 : vector<8xf32> to vector<8x1xf32>
    %33 = vector.extract_strided_slice %17 {offsets = [3, 0], sizes = [1, 32], strides = [1, 1]} : vector<5x32xf32> to vector<1x32xf32>
    %34 = vector.broadcast %33 : vector<1x32xf32> to vector<8x32xf32>
    %35 = arith.mulf %16, %34 : vector<8x32xf32>
    %cst_10 = arith.constant dense<0.000000e+00> : vector<8xf32>
    %36 = vector.multi_reduction <add>, %35, %cst_10 [1] : vector<8x32xf32> to vector<8xf32>
    %37 = vector.shape_cast %36 : vector<8xf32> to vector<8x1xf32>
    %38 = vector.extract_strided_slice %17 {offsets = [4, 0], sizes = [1, 4], strides = [1, 1]} : vector<5x32xf32> to vector<1x4xf32>
    %39 = tpu.concatenate %22, %27, %32, %37 in 1 : vector<8x1xf32>, vector<8x1xf32>, vector<8x1xf32>, vector<8x1xf32> -> vector<8x4xf32>
    %40 = vector.broadcast %38 : vector<1x4xf32> to vector<8x4xf32>
    %41 = arith.addf %39, %40 : vector<8x4xf32>
    %c0_11 = arith.constant 0 : index
    %c0_12 = arith.constant 0 : index
    %42 = vector.load %arg3[%c0_11, %c0_12] : memref<8x4xf32, #tpu.memory_space<vmem>>, vector<8x4xf32>
    tpu.vector_store %arg3[%c0_11, %c0_12], %41 {strides = array<i32>} : memref<8x4xf32, #tpu.memory_space<vmem>>, vector<8x4xf32>,
    %43 = tpu.iota {dimensions = array<i32: 1>} : vector<8x4xi32>
    %cst_13 = arith.constant dense<0xFF800000> : vector<8xf32>
    %44 = vector.multi_reduction <maximumf>, %41, %cst_13 [1] : vector<8x4xf32> to vector<8xf32>
    %45 = vector.shape_cast %44 : vector<8xf32> to vector<8x1xf32>
    %46 = vector.broadcast %45 : vector<8x1xf32> to vector<8x4xf32>
    %47 = arith.cmpf oeq, %41, %46 : vector<8x4xf32>
    %c4_i32 = arith.constant 4 : i32
    %48 = vector.broadcast %c4_i32 : i32 to vector<8x4xi32>
    %49 = arith.select %47, %43, %48 : vector<8x4xi1>, vector<8x4xi32>
    %cst_14 = arith.constant dense<2147483647> : vector<8xi32>
    %50 = vector.multi_reduction <minsi>, %49, %cst_14 [1] : vector<8x4xi32> to vector<8xi32>
    %51 = vector.shape_cast %50 : vector<8xi32> to vector<8x1xi32>
    %c0_15 = arith.constant 0 : index
    %c0_16 = arith.constant 0 : index
    %52 = vector.load %arg4[%c0_15, %c0_16] : memref<8x1xi32, #tpu.memory_space<vmem>>, vector<8x1xi32>
    tpu.vector_store %arg4[%c0_15, %c0_16], %51 {strides = array<i32>} : memref<8x1xi32, #tpu.memory_space<vmem>>, vector<8x1xi32>,
    %53 = vector.broadcast %45 : vector<8x1xf32> to vector<8x4xf32>
    %54 = arith.subf %41, %53 : vector<8x4xf32>
    %55 = math.exp %54 : vector<8x4xf32>
    %cst_17 = arith.constant dense<0.000000e+00> : vector<8xf32>
    %56 = vector.multi_reduction <add>, %55, %cst_17 [1] : vector<8x4xf32> to vector<8xf32>
    %57 = vector.shape_cast %56 : vector<8xf32> to vector<8x1xf32>
    %58 = math.log %57 : vector<8x1xf32>
    %59 = arith.addf %45, %58 : vector<8x1xf32>
    %c0_18 = arith.constant 0 : index
    %c0_19 = arith.constant 0 : index
    %60 = vector.load %arg2[%c0_18, %c0_19] : memref<8x1xi32, #tpu.memory_space<vmem>>, vector<8x1xi32>
    %61 = vector.broadcast %60 : vector<8x1xi32> to vector<8x4xi32>
    %62 = arith.cmpi eq, %43, %61 : vector<8x4xi32>
    %63 = arith.extui %62 : vector<8x4xi1> to vector<8x4xi32>
    %64 = arith.sitofp %63 : vector<8x4xi32> to vector<8x4xf32>
    %65 = arith.mulf %41, %64 : vector<8x4xf32>
    %cst_20 = arith.constant dense<0.000000e+00> : vector<8xf32>
    %66 = vector.multi_reduction <add>, %65, %cst_20 [1] : vector<8x4xf32> to vector<8xf32>
    %67 = vector.shape_cast %66 : vector<8xf32> to vector<8x1xf32>
    %68 = arith.subf %59, %67 : vector<8x1xf32>
    %69 = arith.cmpi eq, %51, %60 : vector<8x1xi32>
    %70 = arith.extui %69 : vector<8x1xi1> to vector<8x1xi32>
    %71 = arith.sitofp %70 : vector<8x1xi32> to vector<8x1xf32>
    %72 = tpu.concatenate %68, %71 in 1 : vector<8x1xf32>, vector<8x1xf32> -> vector<8x2xf32>
    %cst_21 = arith.constant dense<0.000000e+00> : vector<2xf32>
    %73 = vector.multi_reduction <add>, %72, %cst_21 [0] : vector<8x2xf32> to vector<2xf32>
    %74 = vector.shape_cast %73 : vector<2xf32> to vector<1x2xf32>
    %cst_22 = arith.constant 1.250000e-01 : f32
    %75 = vector.broadcast %cst_22 : f32 to vector<1x2xf32>
    %76 = arith.mulf %74, %75 : vector<1x2xf32>
    %c0_23 = arith.constant 0 : index
    %c0_24 = arith.constant 0 : index
    %77 = vector.load %arg5[%c0_23, %c0_24] : memref<1x2xf32, #tpu.memory_space<vmem>>, vector<1x2xf32>
    tpu.vector_store %arg5[%c0_23, %c0_24], %76 {strides = array<i32>} : memref<1x2xf32, #tpu.memory_space<vmem>>, vector<1x2xf32>,
    return
  }
}

</mosaic_0001>

<bundles_post_ra>
// kernel: linear_classifier_forward.1
= control target key start
LH: loop header
LB: loop body
LE: loop exit
PB: predicated region body
PF: predicated region fallthrough
CT: control target
= control target key end

     0   :  { %vm18_vm0 = vcmask 261120   ;;  %v34_v9 = vlaneseq  ;;  %v165_v31 = vmov 0   ;;  %vm66_vm1 = vcmask 7168   ;;  %s167_s24 = smov 1   ;;  %s232_s0 = inlined_call_operand.vmem [shape: f32[8,32], index: 0, kind: input, shape index: {}]   ;;  %s233_s1 = inlined_call_operand.vmem [shape: f32[5,32], index: 1, kind: input, shape index: {}]   ;;  %s234_s3 = inlined_call_operand.vmem [shape: f32[8,4], index: 3, kind: output, shape index: {0}]   ;;  %s235_s2 = inlined_call_operand.vmem [shape: s32[8,1], index: 2, kind: input, shape index: {}]   ;;  %s236_s4 = inlined_call_operand.vmem [shape: s32[8,1], index: 4, kind: output, shape index: {1}]   ;;  %s237_s5 = inlined_call_operand.vmem [shape: f32[1,2], index: 5, kind: output, shape index: {2}]  }
   0x1   :  { %v17_v0 = vld [vmem:[%s232_s0] sm:$0xff]  ;;  %158 = vset.pattern.permute.xlu0 %v165_v31  ;;  %vm68_vm2 = vcmask 15360   ;;  %vm70_vm3 = vcmask 23552   ;;  %vm77_vm4 = vcmask 31744   ;;  %v166_v58 = vmov 0.0  }
   0x2   :  { %v19_v1 = vsel %vm18_vm0, %v17_v0, 0.0  ;;  %v35_v11 = vshrl.u32 %v34_v9, 7  ;;  %v33_v14 = vld [vmem:[%s233_s1] sm:$0x1f]  ;;  %v80_v44 = vand.u32 127, %v34_v9  ;;  %vm139_vm9 = vcmask 8192  }
   0x3   :  { %20 = vadd.xlane.f32.xlu0 %v19_v1  ;;  %v111_v43 = vld [vmem:[%s235_s2] sm:$0xff] }
   0x4   :  { %v52_v12 = vsub.s32 2, %v35_v11  ;;  %v36_v13 = vsub.s32 0, %v35_v11  ;;  %v44_v15 = vsub.s32 1, %v35_v11  ;;  %v60_v21 = vsub.s32 3, %v35_v11 }
   0x5   :  { %v74_v33 = vsub.s32 4, %v35_v11 }
   0x6   :  { %v53_v16 = vrot.slane %v33_v14, %v52_v12  ;;  %v37_v17 = vrot.slane %v33_v14, %v36_v13  ;;  %v45_v20 = vrot.slane %v33_v14, %v44_v15  ;;  %v61_v27 = vrot.slane %v33_v14, %v60_v21 }
   0x7   :  { %v75_v36 = vrot.slane %v33_v14, %v74_v33 }
  0x90   :  { %v21_v2 = vpop.xlane.xlu0 %20 }
  0x91   :  { %v23_v3 = vmul.f32 0.03125, %v21_v2 }
  0x93   :  { %v24_v4 = vsub.f32 %v17_v0, %v23_v3 }
  0x95   :  { %v25_v5 = vmul.f32 %v24_v4, %v24_v4 }
  0x97   :  { %v26_v6 = vsel %vm18_vm0, %v25_v5, 0.0 }
  0x98   :  { %27 = vadd.xlane.f32.xlu0 %v26_v6 }
 0x125   :  { %v28_v7 = vpop.xlane.xlu0 %27 }
 0x126   :  { %v29_v8 = vmul.f32 0.03125, %v28_v7 }
 0x128   :  { %v30_v10 = vadd.f32 1e-05, %v29_v8 }
 0x12a   :  { %159 = vrsqrt.f32 %v30_v10 }
 0x134   :  { %v160_v18 = vpop.eup %159 }
 0x135   :  { %v32_v19 = vmul.f32 %v160_v18, %v24_v4 }
 0x137   :  { %v54_v22 = vmul.f32 %v53_v16, %v32_v19  ;;  %v38_v23 = vmul.f32 %v37_v17, %v32_v19  ;;  %v46_v26 = vmul.f32 %v45_v20, %v32_v19  ;;  %v62_v29 = vmul.f32 %v61_v27, %v32_v19 }
 0x139   :  { %v55_v24 = vsel %vm18_vm0, %v54_v22, 0.0  ;;  %v39_v25 = vsel %vm18_vm0, %v38_v23, 0.0  ;;  %v47_v28 = vsel %vm18_vm0, %v46_v26, 0.0  ;;  %v63_v30 = vsel %vm18_vm0, %v62_v29, 0.0 }
 0x13a   :  { %56 = vadd.xlane.f32.xlu0 %v55_v24  ;;  %40 = vadd.xlane.f32.xlu1 %v39_v25 }
 0x13e   :  { %48 = vadd.xlane.f32.xlu1 %v47_v28 }
 0x142   :  { %64 = vadd.xlane.f32.xlu1 %v63_v30 }
 0x1c7   :  { %v41_v32 = vpop.xlane.xlu1 %40  ;;  %v57_v37 = vpop.xlane.xlu0 %56 }
 0x1cb   :  { %v49_v34 = vpop.xlane.xlu1 %48 }
 0x1cc   :  { %v67_v35 = vsel %vm66_vm1, %v41_v32, %v49_v34 }
 0x1cd   :  { %v69_v38 = vsel %vm68_vm2, %v67_v35, %v57_v37 }
 0x1cf   :  { %v65_v39 = vpop.xlane.xlu1 %64 }
 0x1d0   :  { %v71_v40 = vsel %vm70_vm3, %v69_v38, %v65_v39 }
 0x1d1   :  { %v76_v41 = vadd.f32 %v75_v36, %v71_v40 }
 0x1d3   :  { %v81_v42 = vsel %vm77_vm4, %v76_v41, -inf  ;;  %78 = vst.msk [vmem:[%s234_s3] sm:$0xff] %vm77_vm4, %v76_v41 }
 0x1d4   :  { %82 = vmax.xlane.f32.xlu0 %v81_v42 }
 0x1ea   :  { %113 = vperm.xlu0 %158, %v111_v43  }
 0x261   :  { %v83_v45 = vpop.xlane.xlu0 %82 }
 0x262   :  { %vm84_vm5 = vcmp.eq.f32.partialorder %v76_v41, %v83_v45  ;;  %v102_v50 = vsub.f32 %v76_v41, %v83_v45 }
 0x263   :  { %v85_v46 = vsel %vm84_vm5, %v80_v44, 4 }
 0x264   :  { %v86_v47 = vsel %vm77_vm4, %v85_v46, 2147483647  ;;  %v103_v51 = vmul.f32 1.442695, %v102_v50 }
 0x265   :  { %v88_v48 = vshra.s32 %v86_v47, 16  ;;  %v87_v52 = vand.u32 65535, %v86_v47 }
 0x266   :  { %161 = vpow2.f32 %v103_v51 }
 0x267   :  { %v90_v49 = vcvt.s32.f32 %v88_v48  ;;  %v89_v55 = vcvt.s32.f32 %v87_v52 }
 0x269   :  { %91 = vmin.xlane.f32.xlu1 %v90_v49  ;;  %v114_v53 = vpop.permute.xlu0 %113 }
 0x26a   :  { %vm115_vm6 = vcmp.eq.s32.totalorder %v80_v44, %v114_v53 }
 0x26b   :  { %v153_v59 = vsel %vm115_vm6, 1.0, %v166_v58 }
 0x26c   :  { %v118_v61 = vmul.f32 %v153_v59, %v76_v41 }
 0x26e   :  { %v119_v62 = vsel %vm77_vm4, %v118_v61, 0.0 }
 0x270   :  { %v162_v57 = vpop.eup %161 }
 0x271   :  { %v105_v60 = vsel %vm77_vm4, %v162_v57, 0.0 }
 0x2f6   :  { %v92_v54 = vpop.xlane.xlu1 %91 }
 0x2f7   :  { %vm93_vm7 = vcmp.eq.f32.partialorder %v90_v49, %v92_v54  ;;  %v98_v63 = vcvt.f32.s32 %v92_v54 }
 0x2f8   :  { %v94_v56 = vsel %vm93_vm7, %v89_v55, inf }
 0x2f9   :  { %95 = vmin.xlane.f32.xlu1 %v94_v56  ;;  %v99_v1 = vshll.u32 %v98_v63, 16 }
 0x2fd   :  { %106 = vadd.xlane.f32.xlu1 %v105_v60 }
 0x301   :  { %120 = vadd.xlane.f32.xlu1 %v119_v62 }
 0x386   :  { %v96_v0 = vpop.xlane.xlu1 %95 }
 0x387   :  { %v97_v2 = vcvt.f32.s32 %v96_v0 }
 0x389   :  { %v100_v3 = vadd.s32 %v99_v1, %v97_v2 }
 0x38a   :  { %v107_v5 = vpop.xlane.xlu1 %106 }
 0x38b   :  { %101 = vst.msk [vmem:[%s236_s4] sm:$0xff] %vm66_vm1, %v100_v3  ;;  %vm123_vm8 = vcmp.eq.s32.totalorder %v100_v3, %v111_v43  ;;  %163 = vlog2.f32 %v107_v5 }
 0x38c   :  { %v154_v4 = vsel %vm123_vm8, 1.0, %v166_v58 }
 0x38d   :  { %127 = vrot.lane.b32.xlu1 %v154_v4, %s167_s24 }
 0x38e   :  { %v121_v9 = vpop.xlane.xlu1 %120 }
 0x395   :  { %v164_v6 = vpop.eup %163 }
 0x396   :  { %v109_v7 = vmul.f32 0.6931472, %v164_v6 }
 0x398   :  { %v110_v8 = vadd.f32 %v109_v7, %v83_v45 }
 0x39a   :  { %v122_v10 = vsub.f32 %v110_v8, %v121_v9 }
 0x3ff   :  { %v128_v11 = vpop.permute.xlu1 %127 }
 0x400   :  { %v130_v12 = vsel %vm66_vm1, %v122_v10, %v128_v11 }
 0x401   :  { %v131_v13 = vsel %vm68_vm2, %v130_v12, 0.0 }
 0x402   :  { %v132_v14 = vrot.slane %v131_v13, 4 }
 0x404   :  { %v133_v15 = vadd.f32 %v132_v14, %v131_v13 }
 0x406   :  { %v134_v16 = vrot.slane %v133_v15, 2 }
 0x408   :  { %v135_v17 = vadd.f32 %v134_v16, %v133_v15 }
 0x40a   :  { %v136_v18 = vrot.slane %v135_v17, 1 }
 0x40c   :  { %v137_v19 = vadd.f32 %v136_v18, %v135_v17 }
 0x40e   :  { %v138_v20 = vmul.f32 0.125, %v137_v19 }
 0x410   :  { %140 = vst.msk [vmem:[%s237_s5] sm:$0x1] %vm139_vm9, %v138_v20 }

</bundles_post_ra>
